<compile_context>
chip_gen: v7x
topology: tpu7x:2x2x1
jax: 0.10.0
libtpu: 0.0.40
codegen_flags: <defaults>
</compile_context>

<pallas_src>
import math
import functools

import jax
import jax.numpy as jnp
from jax.experimental import pallas as pl
from jax.experimental.pallas import tpu as pltpu


LANES = 128
SUBLANES = 8
MAX_TILE_ROWS = 1024            # 1024 * 128 * 4 B = 512 KiB per input buffer
MIN_TILE_ROWS = 256             # below this, per-step overhead hurts roofline
NUM_PARALLEL = 2                # leading 'parallel' grid axis
VMEM_LIMIT_BYTES = 32 * 1024 * 1024


def _cdiv(a, b):
    return -(-a // b)


def _plan(rows):
    """Pick (tile_rows, grid_p, grid_k, padded_rows) for a (rows, 128) slab.

    Prefers a tiling that exactly divides `rows` (zero-copy: no pad needed);
    falls back to a padded slab only when no aligned tiling exists.
    """
    if rows <= MAX_TILE_ROWS:
        # One full-extent block: legal BlockSpec regardless of divisibility.
        return rows, 1, 1, rows
    for grid_p in (NUM_PARALLEL, 1):
        for tile_rows in range(MAX_TILE_ROWS, MIN_TILE_ROWS - 1, -SUBLANES):
            if rows % (tile_rows * grid_p) == 0:
                return tile_rows, grid_p, rows // (tile_rows * grid_p), rows
    # No aligned tiling: pad rows up to a full grid of max-size tiles.
    tile_rows = MAX_TILE_ROWS
    grid_k = _cdiv(rows, tile_rows * NUM_PARALLEL)
    return tile_rows, NUM_PARALLEL, grid_k, tile_rows * NUM_PARALLEL * grid_k


# ----------------------------- Pallas kernels ------------------------------

def _make_reduce_kernel(tile_fn, n_inputs):
    """Generic tiled sum-reduction: sum(tile_fn(*inputs)) over all elements."""

    def kernel(*refs):
        in_refs = refs[:n_inputs]
        o_ref = refs[n_inputs]
        acc_ref = refs[n_inputs + 1]
        k = pl.program_id(1)

        @pl.when(k == 0)
        def _init():
            acc_ref[...] = jnp.zeros_like(acc_ref)

        vals = [r[...].astype(jnp.float32) for r in in_refs]
        # Full-tile reduce; VPU/EUP only, no MXU.  Mem-bound regardless.
        acc_ref[...] += jnp.sum(tile_fn(*vals), keepdims=True)

        @pl.when(k == pl.num_programs(1) - 1)
        def _finish():
            o_ref[0] = acc_ref[...]

    return kernel


# ------------------------------- wrappers -----------------------------------

def _tiled_sum(tile_fn, arrays, pad_value):
    """sum(tile_fn(*arrays)) over all elements as one tiled pallas_call."""
    n = int(arrays[0].size)
    rows = max(1, _cdiv(n, LANES))
    tile_rows, grid_p, grid_k, padded_rows = _plan(rows)

    slabs = []
    total = padded_rows * LANES
    for a in arrays:
        flat = jnp.reshape(a, (-1,))
        if total != n:
            # Rare fallback: pad with a reduction-neutral value (copy).
            flat = jnp.pad(flat, (0, total - n), constant_values=pad_value)
        slabs.append(jnp.reshape(flat, (padded_rows, LANES)))

    in_spec = pl.BlockSpec((tile_rows, LANES),
                           lambda p, k: (p * grid_k + k, 0))

    partials = pl.pallas_call(
        _make_reduce_kernel(tile_fn, len(slabs)),
        out_shape=jax.ShapeDtypeStruct((grid_p, 1, 1), jnp.float32),
        grid_spec=pltpu.PrefetchScalarGridSpec(
            num_scalar_prefetch=0,
            grid=(grid_p, grid_k),
            in_specs=[in_spec] * len(slabs),
            out_specs=pl.BlockSpec((1, 1, 1), lambda p, k: (p, 0, 0)),
            scratch_shapes=[pltpu.VMEM((1, 1), jnp.float32)]),
        compiler_params=pltpu.CompilerParams(
            dimension_semantics=("parallel", "arbitrary"),
            vmem_limit_bytes=VMEM_LIMIT_BYTES),
    )(*slabs)
    return jnp.sum(partials)


def _sum_log(x):
    """sum(log(x)) over one array (pad value 1.0 -> log == 0, neutral)."""
    return _tiled_sum(lambda v: jnp.log(v), [x], pad_value=1.0)


def _sum_sq_diff(a, b):
    """sum((a - b)^2) over two equally-shaped arrays (pad 0 -> diff 0, neutral)."""
    return _tiled_sum(lambda u, v: (u - v) * (u - v), [a, b], pad_value=0.0)


def _mse_mean(a, b):
    return _sum_sq_diff(a, b) / jnp.float32(a.size)


# --------------------------- RateDistortionLoss -----------------------------

def rate_distortion_loss(inp, output, target=None, lmbda=0.01):
    """Mirror of RateDistortionLoss.forward (PyTorch).

    `target` is accepted but unused, matching the reference forward.
    # TODO(synk): losses.FocalLoss is constructed in __init__ of the reference
    # module but never used in forward, so it is intentionally omitted here.
    """
    N, _, H, W = inp.shape
    num_pixels = N * H * W

    out = {}

    # bpp_loss = sum_k sum(log(likelihoods_k)) / (-log(2) * num_pixels).
    # One zero-copy reduction per likelihood tensor.
    log_sum = sum(_sum_log(lik) for lik in output['likelihoods'].values())
    out['bpp_loss'] = log_sum / (-math.log(2) * num_pixels)

    # object loss is a constant [0, 0] in the reference.
    out['obect_loss'] = [jnp.float32(0.0), jnp.float32(0.0)]

    # pixel-domain MSE (the dominant, memory-bound reduction).
    out['mse_loss'] = _mse_mean(inp, output['decompressedImage'])

    # feature distillation MSE: sum of per-level means over p2..p6.
    feature_loss = jnp.float32(0.0)
    for p in ('p2', 'p3', 'p4', 'p5', 'p6'):
        s = output['Student_output_features'][p]
        t = output['Teacher_output_features'][p]
        feature_loss = feature_loss + _mse_mean(s, t)
    out['feature_loss'] = feature_loss

    out['loss'] = (1000.0 * out['mse_loss']
                   + 100.0 * out['feature_loss']
                   + 0.0 * (out['obect_loss'][0] + out['obect_loss'][1])
                   + lmbda * out['bpp_loss'])
    return out


# --------------------------------- main --------------------------------------

if __name__ == "__main__":
    key = jax.random.PRNGKey(0)
    ks = jax.random.split(key, 16)

    # small, module-consistent shapes (NCHW)
    N, C, H, W = 2, 3, 16, 16
    FC = 8  # feature channels

    inp = jax.random.normal(ks[0], (N, C, H, W), jnp.float32)
    decompressed = inp + 0.05 * jax.random.normal(ks[1], (N, C, H, W), jnp.float32)

    # likelihoods in (0, 1]
    lik_y = jax.random.uniform(ks[2], (N, 8, H // 4, W // 4), jnp.float32,
                               minval=1e-3, maxval=1.0)
    lik_z = jax.random.uniform(ks[3], (N, 4, H // 8, W // 8), jnp.float32,
                               minval=1e-3, maxval=1.0)

    student, teacher = {}, {}
    feat_shapes = {
        'p2': (N, FC, 16, 16),
        'p3': (N, FC, 8, 8),
        'p4': (N, FC, 4, 4),
        'p5': (N, FC, 2, 2),
        'p6': (N, FC, 1, 1),
    }
    for i, (name, shp) in enumerate(feat_shapes.items()):
        teacher[name] = jax.random.normal(ks[4 + i], shp, jnp.float32)
        student[name] = teacher[name] + 0.1 * jax.random.normal(ks[9 + i], shp, jnp.float32)

    output = {
        'likelihoods': {'y': lik_y, 'z': lik_z},
        'decompressedImage': decompressed,
        'Student_output_features': student,
        'Teacher_output_features': teacher,
    }

    loss_fn = jax.jit(
        functools.partial(rate_distortion_loss, target=None, lmbda=0.01))
    res = loss_fn(inp, output)
    jax.block_until_ready(res['loss'])

    # sanity check vs. plain-JAX reference
    num_pixels = N * H * W
    ref_bpp = (jnp.sum(jnp.log(lik_y)) + jnp.sum(jnp.log(lik_z))) / (-math.log(2) * num_pixels)
    ref_mse = jnp.mean((inp - decompressed) ** 2)
    ref_feat = sum(jnp.mean((student[p] - teacher[p]) ** 2) for p in feat_shapes)
    ref_loss = 1000.0 * ref_mse + 100.0 * ref_feat + 0.01 * ref_bpp

    assert jnp.allclose(res['bpp_loss'], ref_bpp, rtol=1e-5, atol=1e-5)
    assert jnp.allclose(res['mse_loss'], ref_mse, rtol=1e-5, atol=1e-6)
    assert jnp.allclose(res['feature_loss'], ref_feat, rtol=1e-5, atol=1e-6)
    assert jnp.allclose(res['loss'], ref_loss, rtol=1e-5, atol=1e-4)

    print("KERNEL_OK")
</pallas_src>

<mosaic_0001>
module attributes {stable_mosaic.version = 11 : i64} {
  func.func @kernel(%arg0: i32, %arg1: i32, %arg2: memref<1x128xf32, #tpu.memory_space<vmem>>, %arg3: memref<1x128xf32, #tpu.memory_space<vmem>>, %arg4: memref<1x1x1xf32, #tpu.memory_space<vmem>>, %arg5: memref<1x1xf32, #tpu.memory_space<vmem>>) attributes {dimension_semantics = [#tpu.dimension_semantics<parallel>, #tpu.dimension_semantics<arbitrary>], iteration_bounds = array<i64: 1, 1>, scalar_prefetch = 0 : i64, scratch_operands = 1 : i64, tpu.core_type = #tpu.core_type<tc>, window_params = [{transform_indices = @transform_0, window_bounds = array<i64: 1, 128>}, {transform_indices = @transform_1, window_bounds = array<i64: 1, 128>}, {transform_indices = @transform_2, window_bounds = array<i64: 1, 1, 1>}]} {
    %c0_i32 = arith.constant 0 : i32
    %0 = arith.cmpi eq, %arg1, %c0_i32 : i32
    %1 = arith.extui %0 : i1 to i32
    %c0_i32_0 = arith.constant 0 : i32
    %2 = arith.cmpi ne, %1, %c0_i32_0 : i32
    scf.if %2 {
      %cst_10 = arith.constant 0.000000e+00 : f32
      %19 = vector.broadcast %cst_10 : f32 to vector<1x1xf32>
      %c0_11 = arith.constant 0 : index
      %c0_12 = arith.constant 0 : index
      %20 = vector.load %arg5[%c0_11, %c0_12] : memref<1x1xf32, #tpu.memory_space<vmem>>, vector<1x1xf32>
      tpu.vector_store %arg5[%c0_11, %c0_12], %19 {strides = array<i32>} : memref<1x1xf32, #tpu.memory_space<vmem>>, vector<1x1xf32>,
    } else {
    }
    %c0 = arith.constant 0 : index
    %c0_1 = arith.constant 0 : index
    %3 = vector.load %arg2[%c0, %c0_1] : memref<1x128xf32, #tpu.memory_space<vmem>>, vector<1x128xf32>
    %c0_2 = arith.constant 0 : index
    %c0_3 = arith.constant 0 : index
    %4 = vector.load %arg3[%c0_2, %c0_3] : memref<1x128xf32, #tpu.memory_space<vmem>>, vector<1x128xf32>
    %c0_4 = arith.constant 0 : index
    %c0_5 = arith.constant 0 : index
    %5 = vector.load %arg5[%c0_4, %c0_5] : memref<1x1xf32, #tpu.memory_space<vmem>>, vector<1x1xf32>
    %6 = arith.subf %3, %4 : vector<1x128xf32>
    %7 = arith.subf %3, %4 : vector<1x128xf32>
    %8 = arith.mulf %6, %7 : vector<1x128xf32>
    %9 = vector.shape_cast %8 : vector<1x128xf32> to vector<1x1x128xf32>
    %cst = arith.constant dense<0.000000e+00> : vector<1xf32>
    %10 = vector.multi_reduction <add>, %9, %cst [1, 2] : vector<1x1x128xf32> to vector<1xf32>
    %11 = vector.shape_cast %10 : vector<1xf32> to vector<1x1x1xf32>
    %12 = vector.extract %11[0, 0, 0] : f32 from vector<1x1x1xf32>
    %13 = vector.broadcast %12 : f32 to vector<1x1xf32>
    %14 = arith.addf %5, %13 : vector<1x1xf32>
    %c0_6 = arith.constant 0 : index
    %c0_7 = arith.constant 0 : index
    %15 = vector.load %arg5[%c0_6, %c0_7] : memref<1x1xf32, #tpu.memory_space<vmem>>, vector<1x1xf32>
    tpu.vector_store %arg5[%c0_6, %c0_7], %14 {strides = array<i32>} : memref<1x1xf32, #tpu.memory_space<vmem>>, vector<1x1xf32>,
    %c0_i32_8 = arith.constant 0 : i32
    %16 = arith.cmpi eq, %arg1, %c0_i32_8 : i32
    %17 = arith.extui %16 : i1 to i32
    %c0_i32_9 = arith.constant 0 : i32
    %18 = arith.cmpi ne, %17, %c0_i32_9 : i32
    scf.if %18 {
      %c0_10 = arith.constant 0 : index
      %c0_11 = arith.constant 0 : index
      %19 = vector.load %arg5[%c0_10, %c0_11] : memref<1x1xf32, #tpu.memory_space<vmem>>, vector<1x1xf32>
      %c0_12 = arith.constant 0 : index
      %c0_13 = arith.constant 0 : index
      %c0_14 = arith.constant 0 : index
      %20 = vector.load %arg4[%c0_12, %c0_13, %c0_14] : memref<1x1x1xf32, #tpu.memory_space<vmem>>, vector<1x1x1xf32>
      %21 = vector.shape_cast %20 : vector<1x1x1xf32> to vector<1x1xf32>
      %22 = vector.shape_cast %19 : vector<1x1xf32> to vector<1x1x1xf32>
      tpu.vector_store %arg4[%c0_12, %c0_13, %c0_14], %22 {strides = array<i32>} : memref<1x1x1xf32, #tpu.memory_space<vmem>>, vector<1x1x1xf32>,
    } else {
    }
    return
  }
  func.func @transform_0(%arg0: i32, %arg1: i32) -> (i32, i32) {
    %c1_i32 = arith.constant 1 : i32
    %0 = arith.muli %arg0, %c1_i32 : i32
    %1 = arith.addi %0, %arg1 : i32
    %c0_i32 = arith.constant 0 : i32
    %c0_i32_0 = arith.constant 0 : i32
    return %1, %c0_i32 : i32, i32
  }
  func.func @transform_1(%arg0: i32, %arg1: i32) -> (i32, i32) {
    %c1_i32 = arith.constant 1 : i32
    %0 = arith.muli %arg0, %c1_i32 : i32
    %1 = arith.addi %0, %arg1 : i32
    %c0_i32 = arith.constant 0 : i32
    %c0_i32_0 = arith.constant 0 : i32
    return %1, %c0_i32 : i32, i32
  }
  func.func @transform_2(%arg0: i32, %arg1: i32) -> (i32, i32, i32) {
    %c0_i32 = arith.constant 0 : i32
    %c0_i32_0 = arith.constant 0 : i32
    %c0_i32_1 = arith.constant 0 : i32
    return %arg0, %c0_i32, %c0_i32_0 : i32, i32, i32
  }
}

module attributes {stable_mosaic.version = 11 : i64} {
  func.func @kernel(%arg0: i32, %arg1: i32, %arg2: memref<2x128xf32, #tpu.memory_space<vmem>>, %arg3: memref<2x128xf32, #tpu.memory_space<vmem>>, %arg4: memref<1x1x1xf32, #tpu.memory_space<vmem>>, %arg5: memref<1x1xf32, #tpu.memory_space<vmem>>) attributes {dimension_semantics = [#tpu.dimension_semantics<parallel>, #tpu.dimension_semantics<arbitrary>], iteration_bounds = array<i64: 1, 1>, scalar_prefetch = 0 : i64, scratch_operands = 1 : i64, tpu.core_type = #tpu.core_type<tc>, window_params = [{transform_indices = @transform_0, window_bounds = array<i64: 2, 128>}, {transform_indices = @transform_1, window_bounds = array<i64: 2, 128>}, {transform_indices = @transform_2, window_bounds = array<i64: 1, 1, 1>}]} {
    %c0_i32 = arith.constant 0 : i32
    %0 = arith.cmpi eq, %arg1, %c0_i32 : i32
    %1 = arith.extui %0 : i1 to i32
    %c0_i32_0 = arith.constant 0 : i32
    %2 = arith.cmpi ne, %1, %c0_i32_0 : i32
    scf.if %2 {
      %cst_10 = arith.constant 0.000000e+00 : f32
      %19 = vector.broadcast %cst_10 : f32 to vector<1x1xf32>
      %c0_11 = arith.constant 0 : index
      %c0_12 = arith.constant 0 : index
      %20 = vector.load %arg5[%c0_11, %c0_12] : memref<1x1xf32, #tpu.memory_space<vmem>>, vector<1x1xf32>
      tpu.vector_store %arg5[%c0_11, %c0_12], %19 {strides = array<i32>} : memref<1x1xf32, #tpu.memory_space<vmem>>, vector<1x1xf32>,
    } else {
    }
    %c0 = arith.constant 0 : index
    %c0_1 = arith.constant 0 : index
    %3 = vector.load %arg2[%c0, %c0_1] : memref<2x128xf32, #tpu.memory_space<vmem>>, vector<2x128xf32>
    %c0_2 = arith.constant 0 : index
    %c0_3 = arith.constant 0 : index
    %4 = vector.load %arg3[%c0_2, %c0_3] : memref<2x128xf32, #tpu.memory_space<vmem>>, vector<2x128xf32>
    %c0_4 = arith.constant 0 : index
    %c0_5 = arith.constant 0 : index
    %5 = vector.load %arg5[%c0_4, %c0_5] : memref<1x1xf32, #tpu.memory_space<vmem>>, vector<1x1xf32>
    %6 = arith.subf %3, %4 : vector<2x128xf32>
    %7 = arith.subf %3, %4 : vector<2x128xf32>
    %8 = arith.mulf %6, %7 : vector<2x128xf32>
    %9 = vector.shape_cast %8 : vector<2x128xf32> to vector<1x2x128xf32>
    %cst = arith.constant dense<0.000000e+00> : vector<1xf32>
    %10 = vector.multi_reduction <add>, %9, %cst [1, 2] : vector<1x2x128xf32> to vector<1xf32>
    %11 = vector.shape_cast %10 : vector<1xf32> to vector<1x1x1xf32>
    %12 = vector.extract %11[0, 0, 0] : f32 from vector<1x1x1xf32>
    %13 = vector.broadcast %12 : f32 to vector<1x1xf32>
    %14 = arith.addf %5, %13 : vector<1x1xf32>
    %c0_6 = arith.constant 0 : index
    %c0_7 = arith.constant 0 : index
    %15 = vector.load %arg5[%c0_6, %c0_7] : memref<1x1xf32, #tpu.memory_space<vmem>>, vector<1x1xf32>
    tpu.vector_store %arg5[%c0_6, %c0_7], %14 {strides = array<i32>} : memref<1x1xf32, #tpu.memory_space<vmem>>, vector<1x1xf32>,
    %c0_i32_8 = arith.constant 0 : i32
    %16 = arith.cmpi eq, %arg1, %c0_i32_8 : i32
    %17 = arith.extui %16 : i1 to i32
    %c0_i32_9 = arith.constant 0 : i32
    %18 = arith.cmpi ne, %17, %c0_i32_9 : i32
    scf.if %18 {
      %c0_10 = arith.constant 0 : index
      %c0_11 = arith.constant 0 : index
      %19 = vector.load %arg5[%c0_10, %c0_11] : memref<1x1xf32, #tpu.memory_space<vmem>>, vector<1x1xf32>
      %c0_12 = arith.constant 0 : index
      %c0_13 = arith.constant 0 : index
      %c0_14 = arith.constant 0 : index
      %20 = vector.load %arg4[%c0_12, %c0_13, %c0_14] : memref<1x1x1xf32, #tpu.memory_space<vmem>>, vector<1x1x1xf32>
      %21 = vector.shape_cast %20 : vector<1x1x1xf32> to vector<1x1xf32>
      %22 = vector.shape_cast %19 : vector<1x1xf32> to vector<1x1x1xf32>
      tpu.vector_store %arg4[%c0_12, %c0_13, %c0_14], %22 {strides = array<i32>} : memref<1x1x1xf32, #tpu.memory_space<vmem>>, vector<1x1x1xf32>,
    } else {
    }
    return
  }
  func.func @transform_0(%arg0: i32, %arg1: i32) -> (i32, i32) {
    %c1_i32 = arith.constant 1 : i32
    %0 = arith.muli %arg0, %c1_i32 : i32
    %1 = arith.addi %0, %arg1 : i32
    %c0_i32 = arith.constant 0 : i32
    %c0_i32_0 = arith.constant 0 : i32
    return %1, %c0_i32 : i32, i32
  }
  func.func @transform_1(%arg0: i32, %arg1: i32) -> (i32, i32) {
    %c1_i32 = arith.constant 1 : i32
    %0 = arith.muli %arg0, %c1_i32 : i32
    %1 = arith.addi %0, %arg1 : i32
    %c0_i32 = arith.constant 0 : i32
    %c0_i32_0 = arith.constant 0 : i32
    return %1, %c0_i32 : i32, i32
  }
  func.func @transform_2(%arg0: i32, %arg1: i32) -> (i32, i32, i32) {
    %c0_i32 = arith.constant 0 : i32
    %c0_i32_0 = arith.constant 0 : i32
    %c0_i32_1 = arith.constant 0 : i32
    return %arg0, %c0_i32, %c0_i32_0 : i32, i32, i32
  }
}

module attributes {stable_mosaic.version = 11 : i64} {
  func.func @kernel(%arg0: i32, %arg1: i32, %arg2: memref<32x128xf32, #tpu.memory_space<vmem>>, %arg3: memref<32x128xf32, #tpu.memory_space<vmem>>, %arg4: memref<1x1x1xf32, #tpu.memory_space<vmem>>, %arg5: memref<1x1xf32, #tpu.memory_space<vmem>>) attributes {dimension_semantics = [#tpu.dimension_semantics<parallel>, #tpu.dimension_semantics<arbitrary>], iteration_bounds = array<i64: 1, 1>, scalar_prefetch = 0 : i64, scratch_operands = 1 : i64, tpu.core_type = #tpu.core_type<tc>, window_params = [{transform_indices = @transform_0, window_bounds = array<i64: 32, 128>}, {transform_indices = @transform_1, window_bounds = array<i64: 32, 128>}, {transform_indices = @transform_2, window_bounds = array<i64: 1, 1, 1>}]} {
    %c0_i32 = arith.constant 0 : i32
    %0 = arith.cmpi eq, %arg1, %c0_i32 : i32
    %1 = arith.extui %0 : i1 to i32
    %c0_i32_0 = arith.constant 0 : i32
    %2 = arith.cmpi ne, %1, %c0_i32_0 : i32
    scf.if %2 {
      %cst_10 = arith.constant 0.000000e+00 : f32
      %19 = vector.broadcast %cst_10 : f32 to vector<1x1xf32>
      %c0_11 = arith.constant 0 : index
      %c0_12 = arith.constant 0 : index
      %20 = vector.load %arg5[%c0_11, %c0_12] : memref<1x1xf32, #tpu.memory_space<vmem>>, vector<1x1xf32>
      tpu.vector_store %arg5[%c0_11, %c0_12], %19 {strides = array<i32>} : memref<1x1xf32, #tpu.memory_space<vmem>>, vector<1x1xf32>,
    } else {
    }
    %c0 = arith.constant 0 : index
    %c0_1 = arith.constant 0 : index
    %3 = vector.load %arg2[%c0, %c0_1] : memref<32x128xf32, #tpu.memory_space<vmem>>, vector<32x128xf32>
    %c0_2 = arith.constant 0 : index
    %c0_3 = arith.constant 0 : index
    %4 = vector.load %arg3[%c0_2, %c0_3] : memref<32x128xf32, #tpu.memory_space<vmem>>, vector<32x128xf32>
    %c0_4 = arith.constant 0 : index
    %c0_5 = arith.constant 0 : index
    %5 = vector.load %arg5[%c0_4, %c0_5] : memref<1x1xf32, #tpu.memory_space<vmem>>, vector<1x1xf32>
    %6 = arith.subf %3, %4 : vector<32x128xf32>
    %7 = arith.subf %3, %4 : vector<32x128xf32>
    %8 = arith.mulf %6, %7 : vector<32x128xf32>
    %9 = vector.shape_cast %8 : vector<32x128xf32> to vector<1x32x128xf32>
    %cst = arith.constant dense<0.000000e+00> : vector<1xf32>
    %10 = vector.multi_reduction <add>, %9, %cst [1, 2] : vector<1x32x128xf32> to vector<1xf32>
    %11 = vector.shape_cast %10 : vector<1xf32> to vector<1x1x1xf32>
    %12 = vector.extract %11[0, 0, 0] : f32 from vector<1x1x1xf32>
    %13 = vector.broadcast %12 : f32 to vector<1x1xf32>
    %14 = arith.addf %5, %13 : vector<1x1xf32>
    %c0_6 = arith.constant 0 : index
    %c0_7 = arith.constant 0 : index
    %15 = vector.load %arg5[%c0_6, %c0_7] : memref<1x1xf32, #tpu.memory_space<vmem>>, vector<1x1xf32>
    tpu.vector_store %arg5[%c0_6, %c0_7], %14 {strides = array<i32>} : memref<1x1xf32, #tpu.memory_space<vmem>>, vector<1x1xf32>,
    %c0_i32_8 = arith.constant 0 : i32
    %16 = arith.cmpi eq, %arg1, %c0_i32_8 : i32
    %17 = arith.extui %16 : i1 to i32
    %c0_i32_9 = arith.constant 0 : i32
    %18 = arith.cmpi ne, %17, %c0_i32_9 : i32
    scf.if %18 {
      %c0_10 = arith.constant 0 : index
      %c0_11 = arith.constant 0 : index
      %19 = vector.load %arg5[%c0_10, %c0_11] : memref<1x1xf32, #tpu.memory_space<vmem>>, vector<1x1xf32>
      %c0_12 = arith.constant 0 : index
      %c0_13 = arith.constant 0 : index
      %c0_14 = arith.constant 0 : index
      %20 = vector.load %arg4[%c0_12, %c0_13, %c0_14] : memref<1x1x1xf32, #tpu.memory_space<vmem>>, vector<1x1x1xf32>
      %21 = vector.shape_cast %20 : vector<1x1x1xf32> to vector<1x1xf32>
      %22 = vector.shape_cast %19 : vector<1x1xf32> to vector<1x1x1xf32>
      tpu.vector_store %arg4[%c0_12, %c0_13, %c0_14], %22 {strides = array<i32>} : memref<1x1x1xf32, #tpu.memory_space<vmem>>, vector<1x1x1xf32>,
    } else {
    }
    return
  }
  func.func @transform_0(%arg0: i32, %arg1: i32) -> (i32, i32) {
    %c1_i32 = arith.constant 1 : i32
    %0 = arith.muli %arg0, %c1_i32 : i32
    %1 = arith.addi %0, %arg1 : i32
    %c0_i32 = arith.constant 0 : i32
    %c0_i32_0 = arith.constant 0 : i32
    return %1, %c0_i32 : i32, i32
  }
  func.func @transform_1(%arg0: i32, %arg1: i32) -> (i32, i32) {
    %c1_i32 = arith.constant 1 : i32
    %0 = arith.muli %arg0, %c1_i32 : i32
    %1 = arith.addi %0, %arg1 : i32
    %c0_i32 = arith.constant 0 : i32
    %c0_i32_0 = arith.constant 0 : i32
    return %1, %c0_i32 : i32, i32
  }
  func.func @transform_2(%arg0: i32, %arg1: i32) -> (i32, i32, i32) {
    %c0_i32 = arith.constant 0 : i32
    %c0_i32_0 = arith.constant 0 : i32
    %c0_i32_1 = arith.constant 0 : i32
    return %arg0, %c0_i32, %c0_i32_0 : i32, i32, i32
  }
}

module attributes {stable_mosaic.version = 11 : i64} {
  func.func @kernel(%arg0: i32, %arg1: i32, %arg2: memref<8x128xf32, #tpu.memory_space<vmem>>, %arg3: memref<8x128xf32, #tpu.memory_space<vmem>>, %arg4: memref<1x1x1xf32, #tpu.memory_space<vmem>>, %arg5: memref<1x1xf32, #tpu.memory_space<vmem>>) attributes {dimension_semantics = [#tpu.dimension_semantics<parallel>, #tpu.dimension_semantics<arbitrary>], iteration_bounds = array<i64: 1, 1>, scalar_prefetch = 0 : i64, scratch_operands = 1 : i64, tpu.core_type = #tpu.core_type<tc>, window_params = [{transform_indices = @transform_0, window_bounds = array<i64: 8, 128>}, {transform_indices = @transform_1, window_bounds = array<i64: 8, 128>}, {transform_indices = @transform_2, window_bounds = array<i64: 1, 1, 1>}]} {
    %c0_i32 = arith.constant 0 : i32
    %0 = arith.cmpi eq, %arg1, %c0_i32 : i32
    %1 = arith.extui %0 : i1 to i32
    %c0_i32_0 = arith.constant 0 : i32
    %2 = arith.cmpi ne, %1, %c0_i32_0 : i32
    scf.if %2 {
      %cst_10 = arith.constant 0.000000e+00 : f32
      %19 = vector.broadcast %cst_10 : f32 to vector<1x1xf32>
      %c0_11 = arith.constant 0 : index
      %c0_12 = arith.constant 0 : index
      %20 = vector.load %arg5[%c0_11, %c0_12] : memref<1x1xf32, #tpu.memory_space<vmem>>, vector<1x1xf32>
      tpu.vector_store %arg5[%c0_11, %c0_12], %19 {strides = array<i32>} : memref<1x1xf32, #tpu.memory_space<vmem>>, vector<1x1xf32>,
    } else {
    }
    %c0 = arith.constant 0 : index
    %c0_1 = arith.constant 0 : index
    %3 = vector.load %arg2[%c0, %c0_1] : memref<8x128xf32, #tpu.memory_space<vmem>>, vector<8x128xf32>
    %c0_2 = arith.constant 0 : index
    %c0_3 = arith.constant 0 : index
    %4 = vector.load %arg3[%c0_2, %c0_3] : memref<8x128xf32, #tpu.memory_space<vmem>>, vector<8x128xf32>
    %c0_4 = arith.constant 0 : index
    %c0_5 = arith.constant 0 : index
    %5 = vector.load %arg5[%c0_4, %c0_5] : memref<1x1xf32, #tpu.memory_space<vmem>>, vector<1x1xf32>
    %6 = arith.subf %3, %4 : vector<8x128xf32>
    %7 = arith.subf %3, %4 : vector<8x128xf32>
    %8 = arith.mulf %6, %7 : vector<8x128xf32>
    %9 = vector.shape_cast %8 : vector<8x128xf32> to vector<1x8x128xf32>
    %cst = arith.constant dense<0.000000e+00> : vector<1xf32>
    %10 = vector.multi_reduction <add>, %9, %cst [1, 2] : vector<1x8x128xf32> to vector<1xf32>
    %11 = vector.shape_cast %10 : vector<1xf32> to vector<1x1x1xf32>
    %12 = vector.extract %11[0, 0, 0] : f32 from vector<1x1x1xf32>
    %13 = vector.broadcast %12 : f32 to vector<1x1xf32>
    %14 = arith.addf %5, %13 : vector<1x1xf32>
    %c0_6 = arith.constant 0 : index
    %c0_7 = arith.constant 0 : index
    %15 = vector.load %arg5[%c0_6, %c0_7] : memref<1x1xf32, #tpu.memory_space<vmem>>, vector<1x1xf32>
    tpu.vector_store %arg5[%c0_6, %c0_7], %14 {strides = array<i32>} : memref<1x1xf32, #tpu.memory_space<vmem>>, vector<1x1xf32>,
    %c0_i32_8 = arith.constant 0 : i32
    %16 = arith.cmpi eq, %arg1, %c0_i32_8 : i32
    %17 = arith.extui %16 : i1 to i32
    %c0_i32_9 = arith.constant 0 : i32
    %18 = arith.cmpi ne, %17, %c0_i32_9 : i32
    scf.if %18 {
      %c0_10 = arith.constant 0 : index
      %c0_11 = arith.constant 0 : index
      %19 = vector.load %arg5[%c0_10, %c0_11] : memref<1x1xf32, #tpu.memory_space<vmem>>, vector<1x1xf32>
      %c0_12 = arith.constant 0 : index
      %c0_13 = arith.constant 0 : index
      %c0_14 = arith.constant 0 : index
      %20 = vector.load %arg4[%c0_12, %c0_13, %c0_14] : memref<1x1x1xf32, #tpu.memory_space<vmem>>, vector<1x1x1xf32>
      %21 = vector.shape_cast %20 : vector<1x1x1xf32> to vector<1x1xf32>
      %22 = vector.shape_cast %19 : vector<1x1xf32> to vector<1x1x1xf32>
      tpu.vector_store %arg4[%c0_12, %c0_13, %c0_14], %22 {strides = array<i32>} : memref<1x1x1xf32, #tpu.memory_space<vmem>>, vector<1x1x1xf32>,
    } else {
    }
    return
  }
  func.func @transform_0(%arg0: i32, %arg1: i32) -> (i32, i32) {
    %c1_i32 = arith.constant 1 : i32
    %0 = arith.muli %arg0, %c1_i32 : i32
    %1 = arith.addi %0, %arg1 : i32
    %c0_i32 = arith.constant 0 : i32
    %c0_i32_0 = arith.constant 0 : i32
    return %1, %c0_i32 : i32, i32
  }
  func.func @transform_1(%arg0: i32, %arg1: i32) -> (i32, i32) {
    %c1_i32 = arith.constant 1 : i32
    %0 = arith.muli %arg0, %c1_i32 : i32
    %1 = arith.addi %0, %arg1 : i32
    %c0_i32 = arith.constant 0 : i32
    %c0_i32_0 = arith.constant 0 : i32
    return %1, %c0_i32 : i32, i32
  }
  func.func @transform_2(%arg0: i32, %arg1: i32) -> (i32, i32, i32) {
    %c0_i32 = arith.constant 0 : i32
    %c0_i32_0 = arith.constant 0 : i32
    %c0_i32_1 = arith.constant 0 : i32
    return %arg0, %c0_i32, %c0_i32_0 : i32, i32, i32
  }
}

module attributes {stable_mosaic.version = 11 : i64} {
  func.func @kernel(%arg0: i32, %arg1: i32, %arg2: memref<12x128xf32, #tpu.memory_space<vmem>>, %arg3: memref<12x128xf32, #tpu.memory_space<vmem>>, %arg4: memref<1x1x1xf32, #tpu.memory_space<vmem>>, %arg5: memref<1x1xf32, #tpu.memory_space<vmem>>) attributes {dimension_semantics = [#tpu.dimension_semantics<parallel>, #tpu.dimension_semantics<arbitrary>], iteration_bounds = array<i64: 1, 1>, scalar_prefetch = 0 : i64, scratch_operands = 1 : i64, tpu.core_type = #tpu.core_type<tc>, window_params = [{transform_indices = @transform_0, window_bounds = array<i64: 12, 128>}, {transform_indices = @transform_1, window_bounds = array<i64: 12, 128>}, {transform_indices = @transform_2, window_bounds = array<i64: 1, 1, 1>}]} {
    %c0_i32 = arith.constant 0 : i32
    %0 = arith.cmpi eq, %arg1, %c0_i32 : i32
    %1 = arith.extui %0 : i1 to i32
    %c0_i32_0 = arith.constant 0 : i32
    %2 = arith.cmpi ne, %1, %c0_i32_0 : i32
    scf.if %2 {
      %cst_10 = arith.constant 0.000000e+00 : f32
      %19 = vector.broadcast %cst_10 : f32 to vector<1x1xf32>
      %c0_11 = arith.constant 0 : index
      %c0_12 = arith.constant 0 : index
      %20 = vector.load %arg5[%c0_11, %c0_12] : memref<1x1xf32, #tpu.memory_space<vmem>>, vector<1x1xf32>
      tpu.vector_store %arg5[%c0_11, %c0_12], %19 {strides = array<i32>} : memref<1x1xf32, #tpu.memory_space<vmem>>, vector<1x1xf32>,
    } else {
    }
    %c0 = arith.constant 0 : index
    %c0_1 = arith.constant 0 : index
    %3 = vector.load %arg2[%c0, %c0_1] : memref<12x128xf32, #tpu.memory_space<vmem>>, vector<12x128xf32>
    %c0_2 = arith.constant 0 : index
    %c0_3 = arith.constant 0 : index
    %4 = vector.load %arg3[%c0_2, %c0_3] : memref<12x128xf32, #tpu.memory_space<vmem>>, vector<12x128xf32>
    %c0_4 = arith.constant 0 : index
    %c0_5 = arith.constant 0 : index
    %5 = vector.load %arg5[%c0_4, %c0_5] : memref<1x1xf32, #tpu.memory_space<vmem>>, vector<1x1xf32>
    %6 = arith.subf %3, %4 : vector<12x128xf32>
    %7 = arith.subf %3, %4 : vector<12x128xf32>
    %8 = arith.mulf %6, %7 : vector<12x128xf32>
    %9 = vector.shape_cast %8 : vector<12x128xf32> to vector<1x12x128xf32>
    %cst = arith.constant dense<0.000000e+00> : vector<1xf32>
    %10 = vector.multi_reduction <add>, %9, %cst [1, 2] : vector<1x12x128xf32> to vector<1xf32>
    %11 = vector.shape_cast %10 : vector<1xf32> to vector<1x1x1xf32>
    %12 = vector.extract %11[0, 0, 0] : f32 from vector<1x1x1xf32>
    %13 = vector.broadcast %12 : f32 to vector<1x1xf32>
    %14 = arith.addf %5, %13 : vector<1x1xf32>
    %c0_6 = arith.constant 0 : index
    %c0_7 = arith.constant 0 : index
    %15 = vector.load %arg5[%c0_6, %c0_7] : memref<1x1xf32, #tpu.memory_space<vmem>>, vector<1x1xf32>
    tpu.vector_store %arg5[%c0_6, %c0_7], %14 {strides = array<i32>} : memref<1x1xf32, #tpu.memory_space<vmem>>, vector<1x1xf32>,
    %c0_i32_8 = arith.constant 0 : i32
    %16 = arith.cmpi eq, %arg1, %c0_i32_8 : i32
    %17 = arith.extui %16 : i1 to i32
    %c0_i32_9 = arith.constant 0 : i32
    %18 = arith.cmpi ne, %17, %c0_i32_9 : i32
    scf.if %18 {
      %c0_10 = arith.constant 0 : index
      %c0_11 = arith.constant 0 : index
      %19 = vector.load %arg5[%c0_10, %c0_11] : memref<1x1xf32, #tpu.memory_space<vmem>>, vector<1x1xf32>
      %c0_12 = arith.constant 0 : index
      %c0_13 = arith.constant 0 : index
      %c0_14 = arith.constant 0 : index
      %20 = vector.load %arg4[%c0_12, %c0_13, %c0_14] : memref<1x1x1xf32, #tpu.memory_space<vmem>>, vector<1x1x1xf32>
      %21 = vector.shape_cast %20 : vector<1x1x1xf32> to vector<1x1xf32>
      %22 = vector.shape_cast %19 : vector<1x1xf32> to vector<1x1x1xf32>
      tpu.vector_store %arg4[%c0_12, %c0_13, %c0_14], %22 {strides = array<i32>} : memref<1x1x1xf32, #tpu.memory_space<vmem>>, vector<1x1x1xf32>,
    } else {
    }
    return
  }
  func.func @transform_0(%arg0: i32, %arg1: i32) -> (i32, i32) {
    %c1_i32 = arith.constant 1 : i32
    %0 = arith.muli %arg0, %c1_i32 : i32
    %1 = arith.addi %0, %arg1 : i32
    %c0_i32 = arith.constant 0 : i32
    %c0_i32_0 = arith.constant 0 : i32
    return %1, %c0_i32 : i32, i32
  }
  func.func @transform_1(%arg0: i32, %arg1: i32) -> (i32, i32) {
    %c1_i32 = arith.constant 1 : i32
    %0 = arith.muli %arg0, %c1_i32 : i32
    %1 = arith.addi %0, %arg1 : i32
    %c0_i32 = arith.constant 0 : i32
    %c0_i32_0 = arith.constant 0 : i32
    return %1, %c0_i32 : i32, i32
  }
  func.func @transform_2(%arg0: i32, %arg1: i32) -> (i32, i32, i32) {
    %c0_i32 = arith.constant 0 : i32
    %c0_i32_0 = arith.constant 0 : i32
    %c0_i32_1 = arith.constant 0 : i32
    return %arg0, %c0_i32, %c0_i32_0 : i32, i32, i32
  }
}

module attributes {stable_mosaic.version = 11 : i64} {
  func.func @kernel(%arg0: i32, %arg1: i32, %arg2: memref<2x128xf32, #tpu.memory_space<vmem>>, %arg3: memref<1x1x1xf32, #tpu.memory_space<vmem>>, %arg4: memref<1x1xf32, #tpu.memory_space<vmem>>) attributes {dimension_semantics = [#tpu.dimension_semantics<parallel>, #tpu.dimension_semantics<arbitrary>], iteration_bounds = array<i64: 1, 1>, scalar_prefetch = 0 : i64, scratch_operands = 1 : i64, tpu.core_type = #tpu.core_type<tc>, window_params = [{transform_indices = @transform_0, window_bounds = array<i64: 2, 128>}, {transform_indices = @transform_1, window_bounds = array<i64: 1, 1, 1>}]} {
    %c0_i32 = arith.constant 0 : i32
    %0 = arith.cmpi eq, %arg1, %c0_i32 : i32
    %1 = arith.extui %0 : i1 to i32
    %c0_i32_0 = arith.constant 0 : i32
    %2 = arith.cmpi ne, %1, %c0_i32_0 : i32
    scf.if %2 {
      %cst_8 = arith.constant 0.000000e+00 : f32
      %16 = vector.broadcast %cst_8 : f32 to vector<1x1xf32>
      %c0_9 = arith.constant 0 : index
      %c0_10 = arith.constant 0 : index
      %17 = vector.load %arg4[%c0_9, %c0_10] : memref<1x1xf32, #tpu.memory_space<vmem>>, vector<1x1xf32>
      tpu.vector_store %arg4[%c0_9, %c0_10], %16 {strides = array<i32>} : memref<1x1xf32, #tpu.memory_space<vmem>>, vector<1x1xf32>,
    } else {
    }
    %c0 = arith.constant 0 : index
    %c0_1 = arith.constant 0 : index
    %3 = vector.load %arg2[%c0, %c0_1] : memref<2x128xf32, #tpu.memory_space<vmem>>, vector<2x128xf32>
    %c0_2 = arith.constant 0 : index
    %c0_3 = arith.constant 0 : index
    %4 = vector.load %arg4[%c0_2, %c0_3] : memref<1x1xf32, #tpu.memory_space<vmem>>, vector<1x1xf32>
    %5 = math.log %3 : vector<2x128xf32>
    %6 = vector.shape_cast %5 : vector<2x128xf32> to vector<1x2x128xf32>
    %cst = arith.constant dense<0.000000e+00> : vector<1xf32>
    %7 = vector.multi_reduction <add>, %6, %cst [1, 2] : vector<1x2x128xf32> to vector<1xf32>
    %8 = vector.shape_cast %7 : vector<1xf32> to vector<1x1x1xf32>
    %9 = vector.extract %8[0, 0, 0] : f32 from vector<1x1x1xf32>
    %10 = vector.broadcast %9 : f32 to vector<1x1xf32>
    %11 = arith.addf %4, %10 : vector<1x1xf32>
    %c0_4 = arith.constant 0 : index
    %c0_5 = arith.constant 0 : index
    %12 = vector.load %arg4[%c0_4, %c0_5] : memref<1x1xf32, #tpu.memory_space<vmem>>, vector<1x1xf32>
    tpu.vector_store %arg4[%c0_4, %c0_5], %11 {strides = array<i32>} : memref<1x1xf32, #tpu.memory_space<vmem>>, vector<1x1xf32>,
    %c0_i32_6 = arith.constant 0 : i32
    %13 = arith.cmpi eq, %arg1, %c0_i32_6 : i32
    %14 = arith.extui %13 : i1 to i32
    %c0_i32_7 = arith.constant 0 : i32
    %15 = arith.cmpi ne, %14, %c0_i32_7 : i32
    scf.if %15 {
      %c0_8 = arith.constant 0 : index
      %c0_9 = arith.constant 0 : index
      %16 = vector.load %arg4[%c0_8, %c0_9] : memref<1x1xf32, #tpu.memory_space<vmem>>, vector<1x1xf32>
      %c0_10 = arith.constant 0 : index
      %c0_11 = arith.constant 0 : index
      %c0_12 = arith.constant 0 : index
      %17 = vector.load %arg3[%c0_10, %c0_11, %c0_12] : memref<1x1x1xf32, #tpu.memory_space<vmem>>, vector<1x1x1xf32>
      %18 = vector.shape_cast %17 : vector<1x1x1xf32> to vector<1x1xf32>
      %19 = vector.shape_cast %16 : vector<1x1xf32> to vector<1x1x1xf32>
      tpu.vector_store %arg3[%c0_10, %c0_11, %c0_12], %19 {strides = array<i32>} : memref<1x1x1xf32, #tpu.memory_space<vmem>>, vector<1x1x1xf32>,
    } else {
    }
    return
  }
  func.func @transform_0(%arg0: i32, %arg1: i32) -> (i32, i32) {
    %c1_i32 = arith.constant 1 : i32
    %0 = arith.muli %arg0, %c1_i32 : i32
    %1 = arith.addi %0, %arg1 : i32
    %c0_i32 = arith.constant 0 : i32
    %c0_i32_0 = arith.constant 0 : i32
    return %1, %c0_i32 : i32, i32
  }
  func.func @transform_1(%arg0: i32, %arg1: i32) -> (i32, i32, i32) {
    %c0_i32 = arith.constant 0 : i32
    %c0_i32_0 = arith.constant 0 : i32
    %c0_i32_1 = arith.constant 0 : i32
    return %arg0, %c0_i32, %c0_i32_0 : i32, i32, i32
  }
}

module attributes {stable_mosaic.version = 11 : i64} {
  func.func @kernel(%arg0: i32, %arg1: i32, %arg2: memref<1x128xf32, #tpu.memory_space<vmem>>, %arg3: memref<1x1x1xf32, #tpu.memory_space<vmem>>, %arg4: memref<1x1xf32, #tpu.memory_space<vmem>>) attributes {dimension_semantics = [#tpu.dimension_semantics<parallel>, #tpu.dimension_semantics<arbitrary>], iteration_bounds = array<i64: 1, 1>, scalar_prefetch = 0 : i64, scratch_operands = 1 : i64, tpu.core_type = #tpu.core_type<tc>, window_params = [{transform_indices = @transform_0, window_bounds = array<i64: 1, 128>}, {transform_indices = @transform_1, window_bounds = array<i64: 1, 1, 1>}]} {
    %c0_i32 = arith.constant 0 : i32
    %0 = arith.cmpi eq, %arg1, %c0_i32 : i32
    %1 = arith.extui %0 : i1 to i32
    %c0_i32_0 = arith.constant 0 : i32
    %2 = arith.cmpi ne, %1, %c0_i32_0 : i32
    scf.if %2 {
      %cst_8 = arith.constant 0.000000e+00 : f32
      %16 = vector.broadcast %cst_8 : f32 to vector<1x1xf32>
      %c0_9 = arith.constant 0 : index
      %c0_10 = arith.constant 0 : index
      %17 = vector.load %arg4[%c0_9, %c0_10] : memref<1x1xf32, #tpu.memory_space<vmem>>, vector<1x1xf32>
      tpu.vector_store %arg4[%c0_9, %c0_10], %16 {strides = array<i32>} : memref<1x1xf32, #tpu.memory_space<vmem>>, vector<1x1xf32>,
    } else {
    }
    %c0 = arith.constant 0 : index
    %c0_1 = arith.constant 0 : index
    %3 = vector.load %arg2[%c0, %c0_1] : memref<1x128xf32, #tpu.memory_space<vmem>>, vector<1x128xf32>
    %c0_2 = arith.constant 0 : index
    %c0_3 = arith.constant 0 : index
    %4 = vector.load %arg4[%c0_2, %c0_3] : memref<1x1xf32, #tpu.memory_space<vmem>>, vector<1x1xf32>
    %5 = math.log %3 : vector<1x128xf32>
    %6 = vector.shape_cast %5 : vector<1x128xf32> to vector<1x1x128xf32>
    %cst = arith.constant dense<0.000000e+00> : vector<1xf32>
    %7 = vector.multi_reduction <add>, %6, %cst [1, 2] : vector<1x1x128xf32> to vector<1xf32>
    %8 = vector.shape_cast %7 : vector<1xf32> to vector<1x1x1xf32>
    %9 = vector.extract %8[0, 0, 0] : f32 from vector<1x1x1xf32>
    %10 = vector.broadcast %9 : f32 to vector<1x1xf32>
    %11 = arith.addf %4, %10 : vector<1x1xf32>
    %c0_4 = arith.constant 0 : index
    %c0_5 = arith.constant 0 : index
    %12 = vector.load %arg4[%c0_4, %c0_5] : memref<1x1xf32, #tpu.memory_space<vmem>>, vector<1x1xf32>
    tpu.vector_store %arg4[%c0_4, %c0_5], %11 {strides = array<i32>} : memref<1x1xf32, #tpu.memory_space<vmem>>, vector<1x1xf32>,
    %c0_i32_6 = arith.constant 0 : i32
    %13 = arith.cmpi eq, %arg1, %c0_i32_6 : i32
    %14 = arith.extui %13 : i1 to i32
    %c0_i32_7 = arith.constant 0 : i32
    %15 = arith.cmpi ne, %14, %c0_i32_7 : i32
    scf.if %15 {
      %c0_8 = arith.constant 0 : index
      %c0_9 = arith.constant 0 : index
      %16 = vector.load %arg4[%c0_8, %c0_9] : memref<1x1xf32, #tpu.memory_space<vmem>>, vector<1x1xf32>
      %c0_10 = arith.constant 0 : index
      %c0_11 = arith.constant 0 : index
      %c0_12 = arith.constant 0 : index
      %17 = vector.load %arg3[%c0_10, %c0_11, %c0_12] : memref<1x1x1xf32, #tpu.memory_space<vmem>>, vector<1x1x1xf32>
      %18 = vector.shape_cast %17 : vector<1x1x1xf32> to vector<1x1xf32>
      %19 = vector.shape_cast %16 : vector<1x1xf32> to vector<1x1x1xf32>
      tpu.vector_store %arg3[%c0_10, %c0_11, %c0_12], %19 {strides = array<i32>} : memref<1x1x1xf32, #tpu.memory_space<vmem>>, vector<1x1x1xf32>,
    } else {
    }
    return
  }
  func.func @transform_0(%arg0: i32, %arg1: i32) -> (i32, i32) {
    %c1_i32 = arith.constant 1 : i32
    %0 = arith.muli %arg0, %c1_i32 : i32
    %1 = arith.addi %0, %arg1 : i32
    %c0_i32 = arith.constant 0 : i32
    %c0_i32_0 = arith.constant 0 : i32
    return %1, %c0_i32 : i32, i32
  }
  func.func @transform_1(%arg0: i32, %arg1: i32) -> (i32, i32, i32) {
    %c0_i32 = arith.constant 0 : i32
    %c0_i32_0 = arith.constant 0 : i32
    %c0_i32_1 = arith.constant 0 : i32
    return %arg0, %c0_i32, %c0_i32_0 : i32, i32, i32
  }
}

</mosaic_0001>

<bundles_post_ra>
// kernel: rate_distortion_loss.15
= control target key start
LH: loop header
LB: loop body
LE: loop exit
PB: predicated region body
PF: predicated region fallthrough
CT: control target
= control target key end

     0   :  { %s157_s0 = inlined_call_operand.vmem [shape: f32[1,128], index: 0, kind: input, shape index: {}]   ;;  %s158_s1 = inlined_call_operand.vmem [shape: f32[1,128], index: 1, kind: input, shape index: {}]   ;;  %s159_s2 = inlined_call_operand.hbm [shape: f32[1,1,1], index: 2, kind: output, shape index: {}]  }
   0x1   :  { %v46_v0 = vld [vmem:[%s157_s0] sm:$0x1] }
   0x2   :  { %v47_v1 = vld [vmem:[%s158_s1] sm:$0x1] }
   0x3   :  { %v49_v2 = vsub.f32 %v46_v0, %v47_v1 }
   0x4   :  { %7 = vsyncpa [#allocation4], 0  ;;  %vm51_vm0 = vcmask 1040384   ;;  %vm44_vm1 = vcmask 0   ;;  %v119_v5 = vmov 0.0   ;;  %s120_s1 = smov [#allocation3]  }
   0x5   :  { %v50_v3 = vmul.f32 %v49_v2, %v49_v2  ;;  %45 = vst.msk [vmem:[#allocation2] sm:$0x1] %vm44_vm1, %v119_v5  ;;  %s77_s13 = sshll.u32 %s120_s1, 4  ;;  %s78_s13 = int_to_ptr.vmem [resolvable:$true] %s77_s13 }
   0x6   :  { %s95_s14 = scalar_lea.vmem %s78_s13, 16  ;;  %s99_s15 = scalar_lea.vmem %s78_s13, 32 }
   0x7   :  { %v52_v4 = vsel %vm51_vm0, %v50_v3, 0.0  ;;  %p96_p0 = scmp.ne.s32.totalorder %s78_s13, %s95_s14  ;;  %p100_p1 = scmp.lt.s32.totalorder %s78_s13, %s78_s13 }
   0x8   :  { %53 = vadd.xlane.f32.xlu0 %v52_v4  ;;  %p101_p2 = scmp.lt.s32.totalorder %s99_s15, %s95_s14 }
   0xa   :  { %p102_p3 = por %p101_p2, %p100_p1 }
   0xc   :  { %v48_v13 = vld [vmem:[#allocation2] sm:$0x1]  ;;  %p103_p4 = pnand %p102_p3, %p96_p0 }
  0x95   :  { %v54_v6 = vpop.xlane.xlu0 %53 }
  0x96   :  { %v55_v7 = vrot.slane %v54_v6, 4 }
  0x98   :  { %v56_v8 = vadd.f32 %v55_v7, %v54_v6 }
  0x9a   :  { %v57_v9 = vrot.slane %v56_v8, 2 }
  0x9c   :  { %v58_v10 = vadd.f32 %v57_v9, %v56_v8 }
  0x9e   :  { %v59_v11 = vrot.slane %v58_v10, 1 }
  0xa0   :  { %v60_v12 = vadd.f32 %v59_v11, %v58_v10 }
  0xa2   :  { %91 = vpush %v60_v12 }
  0xd3   :  { %s92_s0 = spop %91 }
  0xd4   :  { %v62_v14 = vstv %s92_s0 }
  0xd5   :  { %v63_v15 = vadd.f32 %v62_v14, %v48_v13 }
  0xd7   :  { %65 = vst.msk [vmem:[#allocation2] sm:$0x1] %vm44_vm1, %v63_v15 }
  0xde   :  { %v69_v16 = vld [vmem:[#allocation2] sm:$0x1] }
  0xdf   :  { %70 = vst.msk [vmem:[#allocation3] sm:$0x1] %vm44_vm1, %v69_v16 }
  0xe0   :  { %106 = shalt.err (!%p103_p4)
}
  0xe1   :  { %s107_s18 = scalar_lea.hbm %s159_s2, 16 }
  0xe2   :  { %p108_p5 = scmp.ne.s32.totalorder %s159_s2, %s107_s18  ;;  %p111_p6 = scmp.lt.u32.totalorder %s107_s18, %s159_s2 }
  0xe4   :  { %p113_p7 = pnand %p111_p6, %p108_p5 }
  0xe6   :  { %116 = shalt.err (!%p113_p7)
}
  0xe7   :  { %80 = dma.vmem_to_hbm [thread:$0]  %s78_s13, 16, %s159_s2, [#allocation4]  }
  0xe8   :  { %117 = dma.done.wait [#allocation4], 16  }
  0xe9   :  { %118 = vsyncadd [#allocation4], 4294967280 }
  0xea   :  { %84 = vsyncpa [#allocation4], 1 }

// kernel: rate_distortion_loss.13
= control target key start
LH: loop header
LB: loop body
LE: loop exit
PB: predicated region body
PF: predicated region fallthrough
CT: control target
= control target key end

     0   :  { %s169_s0 = inlined_call_operand.vmem [shape: f32[2,128], index: 0, kind: input, shape index: {}]   ;;  %s170_s1 = inlined_call_operand.vmem [shape: f32[2,128], index: 1, kind: input, shape index: {}]   ;;  %s171_s2 = inlined_call_operand.hbm [shape: f32[1,1,1], index: 2, kind: output, shape index: {}]  }
   0x1   :  { %v52_v0 = vld [vmem:[%s169_s0] sm:$0x3] }
   0x2   :  { %v53_v1 = vld [vmem:[%s170_s1] sm:$0x3] }
   0x3   :  { %v55_v2 = vsub.f32 %v52_v0, %v53_v1 }
   0x4   :  { %7 = vsyncpa [#allocation4], 0  ;;  %vm57_vm0 = vcmask 1041408   ;;  %vm50_vm1 = vcmask 0   ;;  %v131_v5 = vmov 0.0   ;;  %s132_s1 = smov [#allocation3]  }
   0x5   :  { %v56_v3 = vmul.f32 %v55_v2, %v55_v2  ;;  %51 = vst.msk [vmem:[#allocation2] sm:$0x1] %vm50_vm1, %v131_v5  ;;  %s83_s13 = sshll.u32 %s132_s1, 4  ;;  %s84_s13 = int_to_ptr.vmem [resolvable:$true] %s83_s13 }
   0x6   :  { %s107_s14 = scalar_lea.vmem %s84_s13, 16  ;;  %s111_s15 = scalar_lea.vmem %s84_s13, 32 }
   0x7   :  { %v58_v4 = vsel %vm57_vm0, %v56_v3, 0.0  ;;  %p108_p0 = scmp.ne.s32.totalorder %s84_s13, %s107_s14  ;;  %p112_p1 = scmp.lt.s32.totalorder %s84_s13, %s84_s13 }
   0x8   :  { %59 = vadd.xlane.f32.xlu0 %v58_v4  ;;  %p113_p2 = scmp.lt.s32.totalorder %s111_s15, %s107_s14 }
   0xa   :  { %p114_p3 = por %p113_p2, %p112_p1 }
   0xc   :  { %v54_v13 = vld [vmem:[#allocation2] sm:$0x1]  ;;  %p115_p4 = pnand %p114_p3, %p108_p0 }
  0x95   :  { %v60_v6 = vpop.xlane.xlu0 %59 }
  0x96   :  { %v61_v7 = vrot.slane %v60_v6, 4 }
  0x98   :  { %v62_v8 = vadd.f32 %v61_v7, %v60_v6 }
  0x9a   :  { %v63_v9 = vrot.slane %v62_v8, 2 }
  0x9c   :  { %v64_v10 = vadd.f32 %v63_v9, %v62_v8 }
  0x9e   :  { %v65_v11 = vrot.slane %v64_v10, 1 }
  0xa0   :  { %v66_v12 = vadd.f32 %v65_v11, %v64_v10 }
  0xa2   :  { %103 = vpush %v66_v12 }
  0xd3   :  { %s104_s0 = spop %103 }
  0xd4   :  { %v68_v14 = vstv %s104_s0 }
  0xd5   :  { %v69_v15 = vadd.f32 %v68_v14, %v54_v13 }
  0xd7   :  { %71 = vst.msk [vmem:[#allocation2] sm:$0x1] %vm50_vm1, %v69_v15 }
  0xde   :  { %v75_v16 = vld [vmem:[#allocation2] sm:$0x1] }
  0xdf   :  { %76 = vst.msk [vmem:[#allocation3] sm:$0x1] %vm50_vm1, %v75_v16 }
  0xe0   :  { %118 = shalt.err (!%p115_p4)
}
  0xe1   :  { %s119_s18 = scalar_lea.hbm %s171_s2, 16 }
  0xe2   :  { %p120_p5 = scmp.ne.s32.totalorder %s171_s2, %s119_s18  ;;  %p123_p6 = scmp.lt.u32.totalorder %s119_s18, %s171_s2 }
  0xe4   :  { %p125_p7 = pnand %p123_p6, %p120_p5 }
  0xe6   :  { %128 = shalt.err (!%p125_p7)
}
  0xe7   :  { %86 = dma.vmem_to_hbm [thread:$0]  %s84_s13, 16, %s171_s2, [#allocation4]  }
  0xe8   :  { %129 = dma.done.wait [#allocation4], 16  }
  0xe9   :  { %130 = vsyncadd [#allocation4], 4294967280 }
  0xea   :  { %90 = vsyncpa [#allocation4], 1 }

// kernel: rate_distortion_loss.11
= control target key start
LH: loop header
LB: loop body
LE: loop exit
PB: predicated region body
PF: predicated region fallthrough
CT: control target
= control target key end

     0   :  { %s210_s0 = inlined_call_operand.vmem [shape: f32[32,128], index: 0, kind: input, shape index: {}]   ;;  %s211_s1 = inlined_call_operand.vmem [shape: f32[32,128], index: 1, kind: input, shape index: {}]   ;;  %s212_s2 = inlined_call_operand.hbm [shape: f32[1,1,1], index: 2, kind: output, shape index: {}]  }
   0x1   :  { %v62_v0 = vld [vmem:[%s210_s0] sm:$0xff]  ;;  %v63_v1 = vld [vmem:[%s210_s0 + $0x8] sm:$0xff]  ;;  %v64_v2 = vld [vmem:[%s210_s0 + $0x10] sm:$0xff] }
   0x2   :  { %v65_v3 = vld [vmem:[%s210_s0 + $0x18] sm:$0xff]  ;;  %v66_v4 = vld [vmem:[%s211_s1] sm:$0xff]  ;;  %v67_v5 = vld [vmem:[%s211_s1 + $0x8] sm:$0xff] }
   0x3   :  { %v68_v6 = vld [vmem:[%s211_s1 + $0x10] sm:$0xff]  ;;  %v69_v7 = vld [vmem:[%s211_s1 + $0x18] sm:$0xff]  ;;  %v71_v8 = vsub.f32 %v62_v0, %v66_v4  ;;  %v72_v9 = vsub.f32 %v63_v1, %v67_v5 }
   0x4   :  { %7 = vsyncpa [#allocation4], 0  ;;  %v73_v10 = vsub.f32 %v64_v2, %v68_v6  ;;  %v74_v11 = vsub.f32 %v65_v3, %v69_v7  ;;  %vm60_vm0 = vcmask 0   ;;  %v154_v19 = vmov 0.0   ;;  %s155_s1 = smov [#allocation3]  }
   0x5   :  { %v75_v12 = vmul.f32 %v71_v8, %v71_v8  ;;  %v76_v13 = vmul.f32 %v72_v9, %v72_v9  ;;  %61 = vst.msk [vmem:[#allocation2] sm:$0x1] %vm60_vm0, %v154_v19  ;;  %s106_s25 = sshll.u32 %s155_s1, 4  ;;  %s107_s25 = int_to_ptr.vmem [resolvable:$true] %s106_s25 }
   0x6   :  { %v77_v14 = vmul.f32 %v73_v10, %v73_v10  ;;  %v78_v15 = vmul.f32 %v74_v11, %v74_v11  ;;  %s130_s26 = scalar_lea.vmem %s107_s25, 16  ;;  %s134_s27 = scalar_lea.vmem %s107_s25, 32 }
   0x7   :  { %v79_v16 = vadd.f32 %v76_v13, %v75_v12  ;;  %p131_p0 = scmp.ne.s32.totalorder %s107_s25, %s130_s26  ;;  %p135_p1 = scmp.lt.s32.totalorder %s107_s25, %s107_s25 }
   0x8   :  { %p136_p2 = scmp.lt.s32.totalorder %s134_s27, %s130_s26 }
   0x9   :  { %v80_v17 = vadd.f32 %v79_v16, %v77_v14 }
   0xa   :  { %p137_p3 = por %p136_p2, %p135_p1 }
   0xb   :  { %v81_v18 = vadd.f32 %v80_v17, %v78_v15 }
   0xc   :  { %v70_v27 = vld [vmem:[#allocation2] sm:$0x1]  ;;  %p138_p4 = pnand %p137_p3, %p131_p0 }
   0xd   :  { %82 = vadd.xlane.f32.xlu0 %v81_v18 }
  0x9a   :  { %v83_v20 = vpop.xlane.xlu0 %82 }
  0x9b   :  { %v84_v21 = vrot.slane %v83_v20, 4 }
  0x9d   :  { %v85_v22 = vadd.f32 %v84_v21, %v83_v20 }
  0x9f   :  { %v86_v23 = vrot.slane %v85_v22, 2 }
  0xa1   :  { %v87_v24 = vadd.f32 %v86_v23, %v85_v22 }
  0xa3   :  { %v88_v25 = vrot.slane %v87_v24, 1 }
  0xa5   :  { %v89_v26 = vadd.f32 %v88_v25, %v87_v24 }
  0xa7   :  { %126 = vpush %v89_v26 }
  0xd8   :  { %s127_s0 = spop %126 }
  0xd9   :  { %v91_v28 = vstv %s127_s0 }
  0xda   :  { %v92_v29 = vadd.f32 %v91_v28, %v70_v27 }
  0xdc   :  { %94 = vst.msk [vmem:[#allocation2] sm:$0x1] %vm60_vm0, %v92_v29 }
  0xe3   :  { %v98_v30 = vld [vmem:[#allocation2] sm:$0x1] }
  0xe4   :  { %99 = vst.msk [vmem:[#allocation3] sm:$0x1] %vm60_vm0, %v98_v30 }
  0xe5   :  { %141 = shalt.err (!%p138_p4)
}
  0xe6   :  { %s142_s30 = scalar_lea.hbm %s212_s2, 16 }
  0xe7   :  { %p143_p5 = scmp.ne.s32.totalorder %s212_s2, %s142_s30  ;;  %p146_p6 = scmp.lt.u32.totalorder %s142_s30, %s212_s2 }
  0xe9   :  { %p148_p7 = pnand %p146_p6, %p143_p5 }
  0xeb   :  { %151 = shalt.err (!%p148_p7)
}
  0xec   :  { %109 = dma.vmem_to_hbm [thread:$0]  %s107_s25, 16, %s212_s2, [#allocation4]  }
  0xed   :  { %152 = dma.done.wait [#allocation4], 16  }
  0xee   :  { %153 = vsyncadd [#allocation4], 4294967280 }
  0xef   :  { %113 = vsyncpa [#allocation4], 1 }

// kernel: rate_distortion_loss.12
= control target key start
LH: loop header
LB: loop body
LE: loop exit
PB: predicated region body
PF: predicated region fallthrough
CT: control target
= control target key end

     0   :  { %s167_s0 = inlined_call_operand.vmem [shape: f32[8,128], index: 0, kind: input, shape index: {}]   ;;  %s168_s1 = inlined_call_operand.vmem [shape: f32[8,128], index: 1, kind: input, shape index: {}]   ;;  %s169_s2 = inlined_call_operand.hbm [shape: f32[1,1,1], index: 2, kind: output, shape index: {}]  }
   0x1   :  { %v52_v0 = vld [vmem:[%s167_s0] sm:$0xff] }
   0x2   :  { %v53_v1 = vld [vmem:[%s168_s1] sm:$0xff] }
   0x3   :  { %7 = vsyncpa [#allocation4], 0  ;;  %v55_v2 = vsub.f32 %v52_v0, %v53_v1  ;;  %vm50_vm0 = vcmask 0   ;;  %v129_v4 = vmov 0.0   ;;  %s130_s1 = smov [#allocation3]  }
   0x4   :  { %51 = vst.msk [vmem:[#allocation2] sm:$0x1] %vm50_vm0, %v129_v4  ;;  %s81_s13 = sshll.u32 %s130_s1, 4  ;;  %s82_s13 = int_to_ptr.vmem [resolvable:$true] %s81_s13 }
   0x5   :  { %v56_v3 = vmul.f32 %v55_v2, %v55_v2  ;;  %s105_s14 = scalar_lea.vmem %s82_s13, 16  ;;  %s109_s15 = scalar_lea.vmem %s82_s13, 32 }
   0x6   :  { %p106_p0 = scmp.ne.s32.totalorder %s82_s13, %s105_s14  ;;  %p110_p1 = scmp.lt.s32.totalorder %s82_s13, %s82_s13 }
   0x7   :  { %57 = vadd.xlane.f32.xlu0 %v56_v3  ;;  %p111_p2 = scmp.lt.s32.totalorder %s109_s15, %s105_s14 }
   0x9   :  { %p112_p3 = por %p111_p2, %p110_p1 }
   0xb   :  { %v54_v12 = vld [vmem:[#allocation2] sm:$0x1]  ;;  %p113_p4 = pnand %p112_p3, %p106_p0 }
  0x94   :  { %v58_v5 = vpop.xlane.xlu0 %57 }
  0x95   :  { %v59_v6 = vrot.slane %v58_v5, 4 }
  0x97   :  { %v60_v7 = vadd.f32 %v59_v6, %v58_v5 }
  0x99   :  { %v61_v8 = vrot.slane %v60_v7, 2 }
  0x9b   :  { %v62_v9 = vadd.f32 %v61_v8, %v60_v7 }
  0x9d   :  { %v63_v10 = vrot.slane %v62_v9, 1 }
  0x9f   :  { %v64_v11 = vadd.f32 %v63_v10, %v62_v9 }
  0xa1   :  { %101 = vpush %v64_v11 }
  0xd2   :  { %s102_s0 = spop %101 }
  0xd3   :  { %v66_v13 = vstv %s102_s0 }
  0xd4   :  { %v67_v14 = vadd.f32 %v66_v13, %v54_v12 }
  0xd6   :  { %69 = vst.msk [vmem:[#allocation2] sm:$0x1] %vm50_vm0, %v67_v14 }
  0xdd   :  { %v73_v15 = vld [vmem:[#allocation2] sm:$0x1] }
  0xde   :  { %74 = vst.msk [vmem:[#allocation3] sm:$0x1] %vm50_vm0, %v73_v15 }
  0xdf   :  { %116 = shalt.err (!%p113_p4)
}
  0xe0   :  { %s117_s18 = scalar_lea.hbm %s169_s2, 16 }
  0xe1   :  { %p118_p5 = scmp.ne.s32.totalorder %s169_s2, %s117_s18  ;;  %p121_p6 = scmp.lt.u32.totalorder %s117_s18, %s169_s2 }
  0xe3   :  { %p123_p7 = pnand %p121_p6, %p118_p5 }
  0xe5   :  { %126 = shalt.err (!%p123_p7)
}
  0xe6   :  { %84 = dma.vmem_to_hbm [thread:$0]  %s82_s13, 16, %s169_s2, [#allocation4]  }
  0xe7   :  { %127 = dma.done.wait [#allocation4], 16  }
  0xe8   :  { %128 = vsyncadd [#allocation4], 4294967280 }
  0xe9   :  { %88 = vsyncpa [#allocation4], 1 }

// kernel: rate_distortion_loss.10
= control target key start
LH: loop header
LB: loop body
LE: loop exit
PB: predicated region body
PF: predicated region fallthrough
CT: control target
= control target key end

     0   :  { %s190_s0 = inlined_call_operand.vmem [shape: f32[12,128], index: 0, kind: input, shape index: {}]   ;;  %s191_s1 = inlined_call_operand.vmem [shape: f32[12,128], index: 1, kind: input, shape index: {}]   ;;  %s192_s2 = inlined_call_operand.hbm [shape: f32[1,1,1], index: 2, kind: output, shape index: {}]  }
   0x1   :  { %v62_v0 = vld [vmem:[%s190_s0] sm:$0xff]  ;;  %v63_v1 = vld [vmem:[%s190_s0 + $0x8] sm:$0xf] }
   0x2   :  { %v64_v2 = vld [vmem:[%s191_s1] sm:$0xff]  ;;  %v65_v3 = vld [vmem:[%s191_s1 + $0x8] sm:$0xf] }
   0x3   :  { %v67_v4 = vsub.f32 %v62_v0, %v64_v2 }
   0x4   :  { %7 = vsyncpa [#allocation4], 0  ;;  %v68_v5 = vsub.f32 %v63_v1, %v65_v3  ;;  %vm71_vm0 = vcmask 1043456   ;;  %vm60_vm1 = vcmask 0   ;;  %v146_v10 = vmov 0.0   ;;  %s147_s1 = smov [#allocation3]  }
   0x5   :  { %v69_v6 = vmul.f32 %v67_v4, %v67_v4  ;;  %61 = vst.msk [vmem:[#allocation2] sm:$0x1] %vm60_vm1, %v146_v10  ;;  %s98_s17 = sshll.u32 %s147_s1, 4  ;;  %s99_s17 = int_to_ptr.vmem [resolvable:$true] %s98_s17 }
   0x6   :  { %v70_v7 = vmul.f32 %v68_v5, %v68_v5  ;;  %s122_s18 = scalar_lea.vmem %s99_s17, 16  ;;  %s126_s19 = scalar_lea.vmem %s99_s17, 32 }
   0x7   :  { %p123_p0 = scmp.ne.s32.totalorder %s99_s17, %s122_s18  ;;  %p127_p1 = scmp.lt.s32.totalorder %s99_s17, %s99_s17 }
   0x8   :  { %v72_v8 = vsel %vm71_vm0, %v70_v7, 0.0  ;;  %p128_p2 = scmp.lt.s32.totalorder %s126_s19, %s122_s18 }
   0x9   :  { %v73_v9 = vadd.f32 %v72_v8, %v69_v6 }
   0xa   :  { %p129_p3 = por %p128_p2, %p127_p1 }
   0xb   :  { %74 = vadd.xlane.f32.xlu0 %v73_v9 }
   0xc   :  { %v66_v18 = vld [vmem:[#allocation2] sm:$0x1]  ;;  %p130_p4 = pnand %p129_p3, %p123_p0 }
  0x98   :  { %v75_v11 = vpop.xlane.xlu0 %74 }
  0x99   :  { %v76_v12 = vrot.slane %v75_v11, 4 }
  0x9b   :  { %v77_v13 = vadd.f32 %v76_v12, %v75_v11 }
  0x9d   :  { %v78_v14 = vrot.slane %v77_v13, 2 }
  0x9f   :  { %v79_v15 = vadd.f32 %v78_v14, %v77_v13 }
  0xa1   :  { %v80_v16 = vrot.slane %v79_v15, 1 }
  0xa3   :  { %v81_v17 = vadd.f32 %v80_v16, %v79_v15 }
  0xa5   :  { %118 = vpush %v81_v17 }
  0xd6   :  { %s119_s0 = spop %118 }
  0xd7   :  { %v83_v19 = vstv %s119_s0 }
  0xd8   :  { %v84_v20 = vadd.f32 %v83_v19, %v66_v18 }
  0xda   :  { %86 = vst.msk [vmem:[#allocation2] sm:$0x1] %vm60_vm1, %v84_v20 }
  0xe1   :  { %v90_v21 = vld [vmem:[#allocation2] sm:$0x1] }
  0xe2   :  { %91 = vst.msk [vmem:[#allocation3] sm:$0x1] %vm60_vm1, %v90_v21 }
  0xe3   :  { %133 = shalt.err (!%p130_p4)
}
  0xe4   :  { %s134_s22 = scalar_lea.hbm %s192_s2, 16 }
  0xe5   :  { %p135_p5 = scmp.ne.s32.totalorder %s192_s2, %s134_s22  ;;  %p138_p6 = scmp.lt.u32.totalorder %s134_s22, %s192_s2 }
  0xe7   :  { %p140_p7 = pnand %p138_p6, %p135_p5 }
  0xe9   :  { %143 = shalt.err (!%p140_p7)
}
  0xea   :  { %101 = dma.vmem_to_hbm [thread:$0]  %s99_s17, 16, %s192_s2, [#allocation4]  }
  0xeb   :  { %144 = dma.done.wait [#allocation4], 16  }
  0xec   :  { %145 = vsyncadd [#allocation4], 4294967280 }
  0xed   :  { %105 = vsyncpa [#allocation4], 1 }

// kernel: rate_distortion_loss.8
= control target key start
LH: loop header
LB: loop body
LE: loop exit
PB: predicated region body
PF: predicated region fallthrough
CT: control target
= control target key end

     0   :  { %s136_s0 = inlined_call_operand.vmem [shape: f32[2,128], index: 0, kind: input, shape index: {}]   ;;  %s137_s1 = inlined_call_operand.hbm [shape: f32[1,1,1], index: 1, kind: output, shape index: {}]  }
   0x1   :  { %v32_v0 = vld [vmem:[%s136_s0] sm:$0x3] }
   0x2   :  { %6 = vsyncpa [#allocation4], 0  ;;  %80 = vlog2.f32 %v32_v0  ;;  %vm36_vm0 = vcmask 1041408   ;;  %vm30_vm1 = vcmask 0   ;;  %v106_v4 = vmov 0.0   ;;  %s107_s8 = smov [#allocation3]  }
   0x3   :  { %31 = vst.msk [vmem:[#allocation2] sm:$0x1] %vm30_vm1, %v106_v4  ;;  %s62_s9 = sshll.u32 %s107_s8, 4  ;;  %s63_s9 = int_to_ptr.vmem [resolvable:$true] %s62_s9 }
   0x4   :  { %s82_s10 = scalar_lea.vmem %s63_s9, 16  ;;  %s86_s11 = scalar_lea.vmem %s63_s9, 32 }
   0x5   :  { %p83_p0 = scmp.ne.s32.totalorder %s63_s9, %s82_s10  ;;  %p87_p1 = scmp.lt.s32.totalorder %s63_s9, %s63_s9 }
   0x6   :  { %p88_p2 = scmp.lt.s32.totalorder %s86_s11, %s82_s10 }
   0x8   :  { %p89_p3 = por %p88_p2, %p87_p1 }
   0xa   :  { %v33_v12 = vld [vmem:[#allocation2] sm:$0x1]  ;;  %p90_p4 = pnand %p89_p3, %p83_p0 }
   0xc   :  { %v81_v1 = vpop.eup %80 }
   0xd   :  { %v35_v2 = vmul.f32 0.6931472, %v81_v1 }
   0xf   :  { %v37_v3 = vsel %vm36_vm0, %v35_v2, 0.0 }
  0x10   :  { %38 = vadd.xlane.f32.xlu0 %v37_v3 }
  0x9d   :  { %v39_v5 = vpop.xlane.xlu0 %38 }
  0x9e   :  { %v40_v6 = vrot.slane %v39_v5, 4 }
  0xa0   :  { %v41_v7 = vadd.f32 %v40_v6, %v39_v5 }
  0xa2   :  { %v42_v8 = vrot.slane %v41_v7, 2 }
  0xa4   :  { %v43_v9 = vadd.f32 %v42_v8, %v41_v7 }
  0xa6   :  { %v44_v10 = vrot.slane %v43_v9, 1 }
  0xa8   :  { %v45_v11 = vadd.f32 %v44_v10, %v43_v9 }
  0xaa   :  { %76 = vpush %v45_v11 }
  0xdb   :  { %s77_s0 = spop %76 }
  0xdc   :  { %v47_v13 = vstv %s77_s0 }
  0xdd   :  { %v48_v14 = vadd.f32 %v47_v13, %v33_v12 }
  0xdf   :  { %50 = vst.msk [vmem:[#allocation2] sm:$0x1] %vm30_vm1, %v48_v14 }
  0xe6   :  { %v54_v15 = vld [vmem:[#allocation2] sm:$0x1] }
  0xe7   :  { %55 = vst.msk [vmem:[#allocation3] sm:$0x1] %vm30_vm1, %v54_v15 }
  0xe8   :  { %93 = shalt.err (!%p90_p4)
}
  0xe9   :  { %s94_s14 = scalar_lea.hbm %s137_s1, 16 }
  0xea   :  { %p95_p5 = scmp.ne.s32.totalorder %s137_s1, %s94_s14  ;;  %p98_p6 = scmp.lt.u32.totalorder %s94_s14, %s137_s1 }
  0xec   :  { %p100_p7 = pnand %p98_p6, %p95_p5 }
  0xee   :  { %103 = shalt.err (!%p100_p7)
}
  0xef   :  { %65 = dma.vmem_to_hbm [thread:$0]  %s63_s9, 16, %s137_s1, [#allocation4]  }
  0xf0   :  { %104 = dma.done.wait [#allocation4], 16  }
  0xf1   :  { %105 = vsyncadd [#allocation4], 4294967280 }
  0xf2   :  { %69 = vsyncpa [#allocation4], 1 }

// kernel: rate_distortion_loss.9
= control target key start
LH: loop header
LB: loop body
LE: loop exit
PB: predicated region body
PF: predicated region fallthrough
CT: control target
= control target key end

     0   :  { %s130_s0 = inlined_call_operand.vmem [shape: f32[1,128], index: 0, kind: input, shape index: {}]   ;;  %s131_s1 = inlined_call_operand.hbm [shape: f32[1,1,1], index: 1, kind: output, shape index: {}]  }
   0x1   :  { %v29_v0 = vld [vmem:[%s130_s0] sm:$0x1] }
   0x2   :  { %6 = vsyncpa [#allocation4], 0  ;;  %74 = vlog2.f32 %v29_v0  ;;  %vm33_vm0 = vcmask 1040384   ;;  %vm27_vm1 = vcmask 0   ;;  %v100_v4 = vmov 0.0   ;;  %s101_s8 = smov [#allocation3]  }
   0x3   :  { %28 = vst.msk [vmem:[#allocation2] sm:$0x1] %vm27_vm1, %v100_v4  ;;  %s59_s9 = sshll.u32 %s101_s8, 4  ;;  %s60_s9 = int_to_ptr.vmem [resolvable:$true] %s59_s9 }
   0x4   :  { %s76_s10 = scalar_lea.vmem %s60_s9, 16  ;;  %s80_s11 = scalar_lea.vmem %s60_s9, 32 }
   0x5   :  { %p77_p0 = scmp.ne.s32.totalorder %s60_s9, %s76_s10  ;;  %p81_p1 = scmp.lt.s32.totalorder %s60_s9, %s60_s9 }
   0x6   :  { %p82_p2 = scmp.lt.s32.totalorder %s80_s11, %s76_s10 }
   0x8   :  { %p83_p3 = por %p82_p2, %p81_p1 }
   0xa   :  { %v30_v12 = vld [vmem:[#allocation2] sm:$0x1]  ;;  %p84_p4 = pnand %p83_p3, %p77_p0 }
   0xc   :  { %v75_v1 = vpop.eup %74 }
   0xd   :  { %v32_v2 = vmul.f32 0.6931472, %v75_v1 }
   0xf   :  { %v34_v3 = vsel %vm33_vm0, %v32_v2, 0.0 }
  0x10   :  { %35 = vadd.xlane.f32.xlu0 %v34_v3 }
  0x9d   :  { %v36_v5 = vpop.xlane.xlu0 %35 }
  0x9e   :  { %v37_v6 = vrot.slane %v36_v5, 4 }
  0xa0   :  { %v38_v7 = vadd.f32 %v37_v6, %v36_v5 }
  0xa2   :  { %v39_v8 = vrot.slane %v38_v7, 2 }
  0xa4   :  { %v40_v9 = vadd.f32 %v39_v8, %v38_v7 }
  0xa6   :  { %v41_v10 = vrot.slane %v40_v9, 1 }
  0xa8   :  { %v42_v11 = vadd.f32 %v41_v10, %v40_v9 }
  0xaa   :  { %70 = vpush %v42_v11 }
  0xdb   :  { %s71_s0 = spop %70 }
  0xdc   :  { %v44_v13 = vstv %s71_s0 }
  0xdd   :  { %v45_v14 = vadd.f32 %v44_v13, %v30_v12 }
  0xdf   :  { %47 = vst.msk [vmem:[#allocation2] sm:$0x1] %vm27_vm1, %v45_v14 }
  0xe6   :  { %v51_v15 = vld [vmem:[#allocation2] sm:$0x1] }
  0xe7   :  { %52 = vst.msk [vmem:[#allocation3] sm:$0x1] %vm27_vm1, %v51_v15 }
  0xe8   :  { %87 = shalt.err (!%p84_p4)
}
  0xe9   :  { %s88_s14 = scalar_lea.hbm %s131_s1, 16 }
  0xea   :  { %p89_p5 = scmp.ne.s32.totalorder %s131_s1, %s88_s14  ;;  %p92_p6 = scmp.lt.u32.totalorder %s88_s14, %s131_s1 }
  0xec   :  { %p94_p7 = pnand %p92_p6, %p89_p5 }
  0xee   :  { %97 = shalt.err (!%p94_p7)
}
  0xef   :  { %62 = dma.vmem_to_hbm [thread:$0]  %s60_s9, 16, %s131_s1, [#allocation4]  }
  0xf0   :  { %98 = dma.done.wait [#allocation4], 16  }
  0xf1   :  { %99 = vsyncadd [#allocation4], 4294967280 }
  0xf2   :  { %66 = vsyncpa [#allocation4], 1 }

</bundles_post_ra>
